<compile_context>
chip_gen: v7x
topology: tpu7x:2x2x1
jax: 0.10.0
libtpu: 0.0.40
codegen_flags: <defaults>
</compile_context>

<pallas_src>
import functools

import numpy as np
import jax
import jax.numpy as jnp
from jax.experimental import pallas as pl
from jax.experimental.pallas import tpu as pltpu


def _round_up(x, m):
    return ((x + m - 1) // m) * m


def attention_reference(centers, betas, psi, h, w):
    """Pure-JAX transcription of the PyTorch forward (also the small-size path)."""
    fx = jnp.broadcast_to(jnp.linspace(-1.0, 1.0, w, dtype=jnp.float32), (h, w))
    fy = jnp.broadcast_to(jnp.linspace(-1.0, 1.0, h, dtype=jnp.float32)[:, None], (h, w))
    field = jnp.stack([fx, fy])[None, :, None, None, :, :]       # (1,2,1,1,h,w)
    dist = jnp.sum((centers - field) ** 2, axis=1)               # (B,N,K,h,w)
    theta = dist / (2.0 * betas)
    sm = jax.nn.softmax(psi, axis=1)
    attn = jnp.sum(sm / jnp.sqrt(2.0 * np.pi * betas) * jnp.exp(-theta), axis=2)
    return attn                                                  # (B,N,h,w)


def _attention_kernel(coef_ref, red_ref, feat_ref, out_ref, *, use_bf16_exp):
    """One program per spatial tile.

    Block shapes:
      coef_ref: (B*N*K, 4)    fused coefficients [a_fx, a_fy, a_r2, a_1]
      red_ref : (B*N, B*N*K)  0/1 matrix summing the K mixture components per (b,n)
      feat_ref: (4, T)        features [fx, fy, fx^2+fy^2, 1]
      out_ref : (B*N, T)      sublane- and lane-dense output tile
    """
    # MXU: per-(b,n,k) affine exponent over the whole tile. Keep HIGHEST here:
    # the affine re-expansion (c^2 - 2cf + f^2) cancels when centers ~ field.
    s = jnp.dot(coef_ref[...], feat_ref[...],
                preferred_element_type=jnp.float32,
                precision=jax.lax.Precision.HIGHEST)             # (BNK, T)
    if use_bf16_exp:
        # v6e/v7x only: ~2x EUP throughput, halves the `e` temporary, and the
        # reduction becomes a single-pass bf16 MXU matmul (0/1 red is exact).
        e = jnp.exp(s.astype(jnp.bfloat16))
        red = red_ref[...].astype(jnp.bfloat16)
        prec = jax.lax.Precision.DEFAULT
    else:
        e = jnp.exp(s)                                           # EUP
        red = red_ref[...]
        prec = jax.lax.Precision.HIGHEST
    # MXU: reduce over the K mixture components (torch .sum(2)).
    out_ref[...] = jnp.dot(red, e, preferred_element_type=jnp.float32,
                           precision=prec).astype(out_ref.dtype)


def attention_pallas(centers, betas, psi, h, w, *,
                     tile_hw_max=8192,
                     out_dtype=jnp.float32,
                     use_bf16_exp=False,
                     xla_fallback_max_hw=1024,
                     vmem_limit_bytes=32 * 1024 * 1024):
    """centers: (B, 2, N, K, 1, 1), betas/psi: (B, N, K, 1, 1) -> (B, N, h, w)."""
    f32 = jnp.float32
    B = centers.shape[0]
    N = centers.shape[2]
    K = centers.shape[3]
    HW = h * w
    BN = B * N
    BNK = B * N * K

    # For a single tiny tile the fixed pallas_call / single-step overhead
    # exceeds the whole compute: use plain XLA.
    if HW <= xla_fallback_max_hw:
        return attention_reference(centers, betas, psi, h, w).astype(out_dtype)

    # ---- hoisted parameter math (tiny (B,N,K) tensors, stays in XLA) --------
    cx = centers[:, 0, :, :, 0, 0].astype(f32)          # (B, N, K)
    cy = centers[:, 1, :, :, 0, 0].astype(f32)
    bt = betas[:, :, :, 0, 0].astype(f32)
    ps = psi[:, :, :, 0, 0].astype(f32)

    sm = jax.nn.softmax(ps, axis=1)                     # softmax over N (torch dim=1)
    wgt = sm / jnp.sqrt(2.0 * np.pi * bt)
    # Clamp before log so an underflowed softmax entry does not become -inf.
    logw = jnp.log(jnp.maximum(wgt, np.finfo(np.float32).tiny))
    inv2b = 0.5 / bt

    a_fx = 2.0 * cx * inv2b                             # coefficient of fx
    a_fy = 2.0 * cy * inv2b                             # coefficient of fy
    a_r2 = -inv2b                                       # coefficient of fx^2+fy^2
    a_1 = logw - (cx * cx + cy * cy) * inv2b            # constant term
    coef = jnp.stack([a_fx, a_fy, a_r2, a_1], axis=-1).reshape(BNK, 4)

    # Reduction matrix: red[r, c] = 1 iff c // K == r (sums K components per (b,n)).
    red = jnp.repeat(jnp.eye(BN, dtype=f32), K, axis=1)  # (BN, BNK)

    # ---- constant feature slab (single slim 4-row DMA stream) ---------------
    fx = jnp.broadcast_to(jnp.linspace(-1.0, 1.0, w, dtype=f32)[None, :],
                          (h, w)).reshape(HW)
    fy = jnp.broadcast_to(jnp.linspace(-1.0, 1.0, h, dtype=f32)[:, None],
                          (h, w)).reshape(HW)
    r2 = fx * fx + fy * fy
    feat = jnp.stack([fx, fy, r2, jnp.ones_like(fx)], axis=0)    # (4, HW)

    # ---- spatial tiling: lane-dense, VMEM-aware, >= 2 steps for 2-TC chips --
    out_bytes = jnp.dtype(out_dtype).itemsize
    e_bytes = 2 if use_bf16_exp else 4
    # bytes of VMEM per lane-column of the tile:
    #   feat block (double-buffered) + out block (double-buffered)
    #   + the (BNK, tile) s and e temporaries (NOT counted by the BlockSpecs).
    per_col = (2 * 4 * 4
               + 2 * BN * out_bytes
               + BNK * (4 + e_bytes))
    vmem_budget = int(0.6 * vmem_limit_bytes)           # headroom for coef/red/scratch
    tile_cap = max(128, (vmem_budget // per_col) // 128 * 128)
    tile_max = max(128, min(_round_up(tile_hw_max, 128), tile_cap))
    hw_128 = _round_up(HW, 128)
    if hw_128 <= 128:
        tile = 128
    else:
        # >= 2 grid steps so the "parallel" axis can shard across v7x's 2 TCs.
        n_steps = max(2, pl.cdiv(hw_128, tile_max))
        tile = min(_round_up(pl.cdiv(hw_128, n_steps), 128), tile_max)
    hw_pad = pl.cdiv(HW, tile) * tile
    if hw_pad != HW:
        feat = jnp.pad(feat, ((0, 0), (0, hw_pad - HW)))
    grid = (hw_pad // tile,)

    kernel = functools.partial(_attention_kernel, use_bf16_exp=use_bf16_exp)

    out_flat = pl.pallas_call(
        kernel,
        out_shape=jax.ShapeDtypeStruct((BN, hw_pad), out_dtype),
        grid=grid,
        in_specs=[pl.BlockSpec((BNK, 4), lambda j: (0, 0)),
                  pl.BlockSpec((BN, BNK), lambda j: (0, 0)),
                  pl.BlockSpec((4, tile), lambda j: (0, j))],
        out_specs=pl.BlockSpec((BN, tile), lambda j: (0, j)),
        compiler_params=pltpu.CompilerParams(
            dimension_semantics=("parallel",),
            vmem_limit_bytes=vmem_limit_bytes),
    )(coef, red, feat)

    # Padded tail columns see an all-zero feature column (exp(0)=1, sum=K);
    # they MUST be sliced off here.
    return out_flat[:, :HW].reshape(B, N, h, w)


if __name__ == "__main__":
    B, N, K = 2, 4, 8

    key = jax.random.PRNGKey(0)
    k_c, k_b, k_p = jax.random.split(key, 3)

    centers = jax.random.uniform(k_c, (B, 2, N, K, 1, 1),
                                 minval=-1.0, maxval=1.0, dtype=jnp.float32)
    betas = jax.random.uniform(k_b, (B, N, K, 1, 1),
                               minval=0.5, maxval=2.0, dtype=jnp.float32)
    psi = jax.random.normal(k_p, (B, N, K, 1, 1), dtype=jnp.float32)

    # 1) Canonical small spatial shape, forced through the Pallas kernel.
    H, W = 16, 16
    out = attention_pallas(centers, betas, psi, H, W, xla_fallback_max_hw=0)
    out = jax.block_until_ready(out)
    ref = jax.block_until_ready(attention_reference(centers, betas, psi, H, W))
    assert out.shape == (B, N, H, W), out.shape
    assert jnp.allclose(out, ref, atol=1e-4, rtol=1e-4), \
        float(jnp.max(jnp.abs(out - ref)))

    # 2) Non-128-aligned spatial size: multi-step grid + padded tail tile.
    H2, W2 = 48, 40
    out2 = jax.block_until_ready(attention_pallas(centers, betas, psi, H2, W2))
    ref2 = jax.block_until_ready(attention_reference(centers, betas, psi, H2, W2))
    assert out2.shape == (B, N, H2, W2), out2.shape
    assert jnp.allclose(out2, ref2, atol=1e-4, rtol=1e-4), \
        float(jnp.max(jnp.abs(out2 - ref2)))

    print("KERNEL_OK")
</pallas_src>

<mosaic_0001>
module attributes {stable_mosaic.version = 11 : i64} {
  func.func @_attention_kernel(%arg0: i32, %arg1: memref<64x4xf32, #tpu.memory_space<vmem>>, %arg2: memref<8x64xf32, #tpu.memory_space<vmem>>, %arg3: memref<4x128xf32, #tpu.memory_space<vmem>>, %arg4: memref<8x128xf32, #tpu.memory_space<vmem>>) attributes {dimension_semantics = [#tpu.dimension_semantics<parallel>], iteration_bounds = array<i64: 2>, scalar_prefetch = 0 : i64, scratch_operands = 0 : i64, tpu.core_type = #tpu.core_type<tc>, window_params = [{pipeline_mode = #tpu.pipeline_mode<synchronous>, transform_indices = @transform_0, window_bounds = array<i64: 64, 4>}, {pipeline_mode = #tpu.pipeline_mode<synchronous>, transform_indices = @transform_1, window_bounds = array<i64: 8, 64>}, {transform_indices = @transform_2, window_bounds = array<i64: 4, 128>}, {transform_indices = @transform_3, window_bounds = array<i64: 8, 128>}]} {
    %c0 = arith.constant 0 : index
    %c0_0 = arith.constant 0 : index
    %0 = vector.load %arg1[%c0, %c0_0] : memref<64x4xf32, #tpu.memory_space<vmem>>, vector<64x4xf32>
    %c0_1 = arith.constant 0 : index
    %c0_2 = arith.constant 0 : index
    %1 = vector.load %arg3[%c0_1, %c0_2] : memref<4x128xf32, #tpu.memory_space<vmem>>, vector<4x128xf32>
    %cst = arith.constant dense<0.000000e+00> : vector<64x128xf32>
    %2 = tpu.matmul %0, %1, %cst {dimension_numbers = #tpu.dot_dimension_numbers<[1], [0], [0], [1], [0, 0, 1, 1], [], []>, precision = #tpu.contract_precision<fp32>} : vector<64x4xf32>, vector<4x128xf32>, vector<64x128xf32> -> vector<64x128xf32>
    %3 = math.exp %2 : vector<64x128xf32>
    %c0_3 = arith.constant 0 : index
    %c0_4 = arith.constant 0 : index
    %4 = vector.load %arg2[%c0_3, %c0_4] : memref<8x64xf32, #tpu.memory_space<vmem>>, vector<8x64xf32>
    %cst_5 = arith.constant dense<0.000000e+00> : vector<8x128xf32>
    %5 = tpu.matmul %4, %3, %cst_5 {dimension_numbers = #tpu.dot_dimension_numbers<[1], [0], [0], [1], [0, 0, 1, 1], [], []>, precision = #tpu.contract_precision<fp32>} : vector<8x64xf32>, vector<64x128xf32>, vector<8x128xf32> -> vector<8x128xf32>
    %c0_6 = arith.constant 0 : index
    %c0_7 = arith.constant 0 : index
    %6 = vector.load %arg4[%c0_6, %c0_7] : memref<8x128xf32, #tpu.memory_space<vmem>>, vector<8x128xf32>
    tpu.vector_store %arg4[%c0_6, %c0_7], %5 {strides = array<i32>} : memref<8x128xf32, #tpu.memory_space<vmem>>, vector<8x128xf32>,
    return
  }
  func.func @transform_0(%arg0: i32) -> (i32, i32) {
    %c0_i32 = arith.constant 0 : i32
    %c0_i32_0 = arith.constant 0 : i32
    %c0_i32_1 = arith.constant 0 : i32
    return %c0_i32, %c0_i32_0 : i32, i32
  }
  func.func @transform_1(%arg0: i32) -> (i32, i32) {
    %c0_i32 = arith.constant 0 : i32
    %c0_i32_0 = arith.constant 0 : i32
    %c0_i32_1 = arith.constant 0 : i32
    return %c0_i32, %c0_i32_0 : i32, i32
  }
  func.func @transform_2(%arg0: i32) -> (i32, i32) {
    %c0_i32 = arith.constant 0 : i32
    %c0_i32_0 = arith.constant 0 : i32
    return %c0_i32, %arg0 : i32, i32
  }
  func.func @transform_3(%arg0: i32) -> (i32, i32) {
    %c0_i32 = arith.constant 0 : i32
    %c0_i32_0 = arith.constant 0 : i32
    return %c0_i32, %arg0 : i32, i32
  }
}

</mosaic_0001>

<bundles_post_ra>
// kernel: tpu_custom_call.1
= control target key start
LH: loop header
LB: loop body
LE: loop exit
PB: predicated region body
PF: predicated region fallthrough
CT: control target
= control target key end

     0   :  { %8 = vsyncpa [#allocation3], 0  ;;  %s2508_s0 = inlined_call_operand.vmem [shape: f32[64,4], index: 0, kind: input, shape index: {}]   ;;  %s2509_s1 = inlined_call_operand.vmem [shape: f32[8,64], index: 1, kind: input, shape index: {}]   ;;  %s2510_s2 = inlined_call_operand.vmem [shape: f32[4,256], index: 2, kind: input, shape index: {}]   ;;  %s2511_s3 = inlined_call_operand.hbm [shape: f32[8,256], index: 3, kind: output, shape index: {}]  }
   0x1   :  { %10 = vsyncpa [#allocation3 + $0x1], 0  ;;  %s2167_s12 = smov 0   ;;  %s2169_s13 = smov 0  }
   0x2   :  { %s2171_s14 = smov 0   ;;  %s2173_s15 = smov 0  }
   0x3 LB: > { %s2188_s16 = sadd.s32 4294967295, %s2141_s15   ;;  %s1583_s17 = sadd.s32 4294967294, %s2141_s15   ;;  %s2141_s15 = sphi %s2173_s15, %s2517_s15   ;;  %s2137_s14 = sphi %s2171_s14, %s2516_s14   ;;  %s2133_s13 = sphi %s2169_s13, %s2515_s13   ;;  %s2129_s12 = sphi %s2167_s12, %s2514_s12  }
   0x4   : > { %s2192_s18 = sadd.s32 1, %s2141_s15   ;;  %s91_s19 = sadd.s32 1, %s2137_s14 }
   0x5   : > { %s88_s20 = ssub.s32 %s2141_s15, %s2192_s18  ;;  %p101_p0 = scmp.ne.s32.totalorder %s2137_s14, %s2133_s13 }
   0x6   : > { %p89_p1 = scmp.eq.s32.totalorder %s88_s20, 0  ;;  %p102_p2 = scmp.eq.s32.totalorder %s2188_s16, 1 }
   0x7   : > { %p107_p3 = scmp.ne.s32.totalorder %s2133_s13, %s2129_s12  ;;  %p108_p4 = scmp.eq.s32.totalorder %s1583_s17, 1 }
   0x8   : > { %s2203_s21 = scalar_select %p89_p1, %s2137_s14, %s91_s19  }
   0x9   : > { %p2205_p5 = por %p102_p2, %p101_p0  ;;  %p2209_p6 = por %p108_p4, %p107_p3 }
   0xa   : > { %p1586_p7 = scmp.ge.s32.totalorder %s2141_s15, 1  ;;  %p139_p8 = scmp.lt.s32.totalorder %s2141_s15, 3 }
   0xc   : > { %p140_p9 = pnand %p1586_p7, %p139_p8 }
   0xd   : > { %p162_p10 = scmp.lt.s32.totalorder (!%p140_p9), %s2188_s16, 1  ;;  %vm200_vm0 = vcmask (!%p140_p9), 1043456   ;;  %v166_v0 = vld [vmem:[%s2508_s0] sm:$0xff] (!%p140_p9)  ;;  %vm175_vm1 = vcmask (!%p140_p9), 31744   ;;  %v167_v1 = vld [vmem:[%s2508_s0 + $0x8] sm:$0xff] (!%p140_p9)  ;;  %v168_v2 = vld [vmem:[%s2508_s0 + $0x10] sm:$0xff] (!%p140_p9) }
   0xe   : > { %143 = sbr.rel (%p140_p9) target bundleno = 662 (0x296), region = 32  ;;  %v177_v3 = vsel (!%p140_p9), %vm175_vm1, %v166_v0, 0  ;;  %v180_v4 = vsel (!%p140_p9), %vm175_vm1, %v167_v1, 0  ;;  %v183_v5 = vsel (!%p140_p9), %vm175_vm1, %v168_v2, 0  ;;  %v169_v6 = vld [vmem:[%s2508_s0 + $0x18] sm:$0xff] (!%p140_p9)  ;;  %v170_v7 = vld [vmem:[%s2508_s0 + $0x20] sm:$0xff] (!%p140_p9) }
   0xf   : > { %v171_v8 = vld [vmem:[%s2508_s0 + $0x28] sm:$0xff] (!%p140_p9)  ;;  %v2238_v9 = vand.u32 (!%p140_p9), 4294901760, %v177_v3  ;;  %v2240_v10 = vand.u32 (!%p140_p9), 4294901760, %v180_v4  ;;  %v2242_v11 = vand.u32 (!%p140_p9), 4294901760, %v183_v5  ;;  %v186_v12 = vsel (!%p140_p9), %vm175_vm1, %v169_v6, 0  ;;  %v172_v13 = vld [vmem:[%s2508_s0 + $0x30] sm:$0xff] (!%p140_p9) }
  0x10   : > { %v2248_v14 = vand.u32 (!%p140_p9), 4294901760, %v186_v12  ;;  %v189_v15 = vsel (!%p140_p9), %vm175_vm1, %v170_v7, 0  ;;  %v192_v16 = vsel (!%p140_p9), %vm175_vm1, %v171_v8, 0  ;;  %v195_v17 = vsel (!%p140_p9), %vm175_vm1, %v172_v13, 0  ;;  %v173_v18 = vld [vmem:[%s2508_s0 + $0x38] sm:$0xff] (!%p140_p9)  ;;  %s159_s29 = sand.u32 (!%p140_p9), 1, %s2133_s13  }
  0x11   : > { %v2257_v19 = vsub.f32 (!%p140_p9), %v177_v3, %v2238_v9  ;;  %v2260_v20 = vsub.f32 (!%p140_p9), %v180_v4, %v2240_v10  ;;  %v2263_v21 = vsub.f32 (!%p140_p9), %v183_v5, %v2242_v11  ;;  %v2265_v22 = vand.u32 (!%p140_p9), 4294901760, %v189_v15  ;;  %s1587_s30 = sshll.u32 (!%p140_p9), %s159_s29, 3  ;;  %s1590_s6 = sshll.u32 (!%p140_p9), %s2188_s16, 7 }
  0x12   : > { %v2271_v23 = vsub.f32 (!%p140_p9), %v186_v12, %v2248_v14  ;;  %v2273_v24 = vand.u32 (!%p140_p9), 4294901760, %v192_v16  ;;  %v2275_v25 = vand.u32 (!%p140_p9), 4294901760, %v195_v17  ;;  %v198_v26 = vsel (!%p140_p9), %vm175_vm1, %v173_v18, 0  ;;  %s161_s4 = scalar_lea.vmem (!%p140_p9), [#allocation2], %s1587_s30  ;;  %s1511_s10 = scalar_lea.sflag (!%p140_p9), [#allocation3], %s159_s29 }
  0x13   : > { %v272_v28 = vand.u32 (!%p140_p9), 4294901760, %v2257_v19  ;;  %v282_v29 = vand.u32 (!%p140_p9), 4294901760, %v2260_v20  ;;  %v292_v30 = vand.u32 (!%p140_p9), 4294901760, %v2263_v21  ;;  %v2282_v31 = vsub.f32 (!%p140_p9), %v189_v15, %v2265_v22  ;;  %s1524_s5 = sshll.u32 (!%p140_p9), %s161_s4, 4  ;;  %s2463_s5 = int_to_ptr.vmem [resolvable:$true] %s1524_s5 }
  0x14   : > { %v302_v33 = vand.u32 (!%p140_p9), 4294901760, %v2271_v23  ;;  %v2287_v34 = vsub.f32 (!%p140_p9), %v192_v16, %v2273_v24  ;;  %v2290_v35 = vsub.f32 (!%p140_p9), %v195_v17, %v2275_v25  ;;  %v2313_v50 = vand.u32 (!%p140_p9), 4294901760, %v198_v26  ;;  %s2079_s11 = scalar_lea.vmem (!%p140_p9), %s2463_s5, 128 }
  0x15   : > { %s163_s9 = scalar_select %p162_p10, %s2188_s16, 1  ;;  %v273_v37 = vsub.f32 %v2257_v19, %v272_v28  ;;  %v283_v38 = vsub.f32 %v2260_v20, %v282_v29  ;;  %v293_v39 = vsub.f32 %v2263_v21, %v292_v30  ;;  %v312_v41 = vand.u32 4294901760, %v2282_v31 }
  0x16   : > { %v303_v40 = vsub.f32 %v2271_v23, %v302_v33  ;;  %v322_v42 = vand.u32 4294901760, %v2287_v34  ;;  %v332_v43 = vand.u32 4294901760, %v2290_v35  ;;  %v341_v56 = vsub.f32 %v198_v26, %v2313_v50  ;;  %p2080_p11 = scmp.ne.s32.totalorder %s2463_s5, %s2079_s11  ;;  %s2146_s16 = smov [#allocation2]  }
  0x17   : > { %s1588_s20 = sshll.u32 %s163_s9, 2  ;;  %v274_v44 = vand.u32 4294901760, %v273_v37  ;;  %v284_v45 = vand.u32 4294901760, %v283_v38  ;;  %v294_v46 = vand.u32 4294901760, %v293_v39  ;;  %v313_v48 = vsub.f32 %v2282_v31, %v312_v41  ;;  %s2468_s9 = scalar_lea.hbm %s2511_s3, %s1590_s6 }
  0x18   : > { %s165_s26 = scalar_lea.vmem %s2510_s2, %s1588_s20  ;;  %v304_v51 = vand.u32 4294901760, %v303_v40  ;;  %v323_v52 = vsub.f32 %v2287_v34, %v322_v42  ;;  %v333_v55 = vsub.f32 %v2290_v35, %v332_v43  ;;  %v342_v58 = vand.u32 4294901760, %v341_v56  ;;  %p2081_p12 = pnand %p2080_p11, %p2205_p5 }
  0x19   : > { %v174_v27 = vld [vmem:[%s165_s26] sm:$0xf]  ;;  %1703 = vmatprep.mubr.f32.mxu0 %v274_v44  ;;  %v314_v54 = vand.u32 4294901760, %v313_v48  ;;  %v2143_v63 = vmov 0.0|0.0   ;;  %vm2144_vm2 = vmmov 0   ;;  %v2145_v0 = vmov 0.0  }
  0x1a   : > { %v202_v32 = vsel %vm200_vm0, %v174_v27, 0  ;;  %v324_v59 = vand.u32 4294901760, %v323_v52  ;;  %v334_v60 = vand.u32 4294901760, %v333_v55  ;;  %v343_v61 = vsub.f32 %v341_v56, %v342_v58  ;;  %1899 = vmatprep.subr.bf16.mxu1 %v2143_v63  ;;  %1801 = vmatprep.mubr.msk.f32.mxu1 %vm2144_vm2, %v2145_v0  ;;  %p2082_p13 = pneg %p2081_p12  ;;  %s2083_s17 = sshll.u32 %s2146_s16, 4  ;;  %s2084_s17 = int_to_ptr.vmem [resolvable:$false] %s2083_s17 }
  0x1b   : > { %v2292_v36 = vand.u32 4294901760, %v202_v32  ;;  %vm968_vm3 = vcmask 523264   ;;  %s2085_s19 = scalar_lea.vmem %s2084_s17, 256  ;;  %p2086_p0 = scmp.lt.s32.totalorder %s2463_s5, %s2084_s17 }
  0x1c   : > { %v344_v62 = vand.u32 4294901760, %v343_v61  ;;  %p2087_p1 = scmp.lt.s32.totalorder %s2085_s19, %s2079_s11 }
  0x1d   : > { %1701 = vmatprep.subr.mxu0 %v2292_v36  ;;  %v352_v47 = vsub.f32 %v202_v32, %v2292_v36 }
  0x1e   : > { %1702 = vmatpush3.msra.mxu0 %v2292_v36  ;;  %p2088_p2 = por %p2087_p1, %p2086_p0 }
  0x1f   : > { %v353_v49 = vand.u32 4294901760, %v352_v47  ;;  %1704 = vmatmul.mubr.f32.vlgmr.msra.gmra.mrb[0].mxu0 %v284_v45 }
  0x20   : > { %1706 = vmatprep.mubr.f32.mxu0 %v294_v46  ;;  %p2089_p3 = pnand %p2088_p2, %p2082_p13 }
  0x21   : > { %v354_v53 = vsub.f32 %v352_v47, %v353_v49 }
  0x23   : > { %v355_v57 = vand.u32 4294901760, %v354_v53  ;;  %1707 = vmatmul.mubr.f32.gmra.mrb[2].mxu0 %v304_v51 }
  0x24   : > { %1709 = vmatprep.mubr.f32.mxu0 %v314_v54 }
  0x25   : > { %1715 = vmatprep.subr.mxu0 %v355_v57 }
  0x26   : > { %1716 = vmatpush3.msra.mxu0 %v355_v57 }
  0x27   : > { %1729 = vmatprep.subr.mxu0 %v352_v47  ;;  %1710 = vmatmul.mubr.f32.gmra.mrb[4].mxu0 %v324_v59 }
  0x28   : > { %1712 = vmatprep.mubr.f32.mxu0 %v334_v60 }
  0x2b   : > { %1713 = vmatmul.mubr.f32.gmra.mrb[6].mxu0 %v344_v62 }
  0x2c   : > { %1717 = vmatprep.mubr.f32.mxu0 %v2238_v9 }
  0x2f   : > { %1718 = vmatmul.mubr.f32.vlgmr.msra.gmra.mrb[0].mxu0 %v2240_v10 }
  0x30   : > { %1720 = vmatprep.mubr.f32.mxu0 %v2242_v11  ;;  %1730 = vmatpush3.msra.mxu0 %v352_v47 }
  0x31   : > { %1743 = vmatprep.subr.mxu0 %v2292_v36 }
  0x33   : > { %1721 = vmatmul.mubr.f32.gmra.mrb[2].mxu0 %v2248_v14 }
  0x34   : > { %1723 = vmatprep.mubr.f32.mxu0 %v2265_v22 }
  0x37   : > { %1724 = vmatmul.mubr.f32.gmra.mrb[4].mxu0 %v2273_v24 }
  0x38   : > { %1726 = vmatprep.mubr.f32.mxu0 %v2275_v25 }
  0x3b   : > { %1727 = vmatmul.mubr.f32.gmra.mrb[6].mxu0 %v2313_v50 }
  0x3c   : > { %1731 = vmatprep.mubr.f32.mxu0 %v2257_v19 }
  0x3f   : > { %1732 = vmatmul.mubr.f32.vlgmr.msra.gmra.mrb[0].mxu0 %v2260_v20 }
  0x40   : > { %1734 = vmatprep.mubr.f32.mxu0 %v2263_v21  ;;  %1744 = vmatpush3.msra.mxu0 %v2292_v36 }
  0x41   : > { %1757 = vmatprep.subr.mxu0 %v353_v49 }
  0x43   : > { %1735 = vmatmul.mubr.f32.gmra.mrb[2].mxu0 %v2271_v23 }
  0x44   : > { %1737 = vmatprep.mubr.f32.mxu0 %v2282_v31 }
  0x47   : > { %1738 = vmatmul.mubr.f32.gmra.mrb[4].mxu0 %v2287_v34 }
  0x48   : > { %1740 = vmatprep.mubr.f32.mxu0 %v2290_v35 }
  0x4b   : > { %1741 = vmatmul.mubr.f32.gmra.mrb[6].mxu0 %v341_v56 }
  0x4c   : > { %1745 = vmatprep.mubr.f32.mxu0 %v272_v28 }
  0x4f   : > { %1746 = vmatmul.mubr.f32.vlgmr.msra.gmra.mrb[0].mxu0 %v282_v29 }
  0x50   : > { %1748 = vmatprep.mubr.f32.mxu0 %v292_v30  ;;  %1758 = vmatpush3.msra.mxu0 %v353_v49 }
  0x51   : > { %1771 = vmatprep.subr.mxu0 %v2292_v36 }
  0x53   : > { %1749 = vmatmul.mubr.f32.gmra.mrb[2].mxu0 %v302_v33 }
  0x54   : > { %1751 = vmatprep.mubr.f32.mxu0 %v312_v41 }
  0x57   : > { %1752 = vmatmul.mubr.f32.gmra.mrb[4].mxu0 %v322_v42 }
  0x58   : > { %1754 = vmatprep.mubr.f32.mxu0 %v332_v43 }
  0x5b   : > { %1755 = vmatmul.mubr.f32.gmra.mrb[6].mxu0 %v342_v58 }
  0x5c   : > { %1759 = vmatprep.mubr.f32.mxu0 %v2238_v9 }
  0x5f   : > { %1760 = vmatmul.mubr.f32.vlgmr.msra.gmra.mrb[0].mxu0 %v2240_v10 }
  0x60   : > { %1762 = vmatprep.mubr.f32.mxu0 %v2242_v11  ;;  %1772 = vmatpush3.msra.mxu0 %v2292_v36 }
  0x63   : > { %1763 = vmatmul.mubr.f32.gmra.mrb[2].mxu0 %v2248_v14 }
  0x64   : > { %1765 = vmatprep.mubr.f32.mxu0 %v2265_v22 }
  0x67   : > { %1766 = vmatmul.mubr.f32.gmra.mrb[4].mxu0 %v2273_v24 }
  0x68   : > { %1768 = vmatprep.mubr.f32.mxu0 %v2275_v25 }
  0x6b   : > { %1769 = vmatmul.mubr.f32.gmra.mrb[6].mxu0 %v2313_v50 }
  0x6c   : > { %1773 = vmatprep.mubr.f32.mxu0 %v2238_v9  ;;  %v967_v9 = vld [vmem:[%s2509_s1] sm:$0xff] }
  0x6d   : > { %v970_v13 = vsel %vm968_vm3, %v967_v9, 0 }
  0x6e   : > { %v2367_v16 = vand.u32 4294901760, %v970_v13 }
  0x6f   : > { %1774 = vmatmul.mubr.f32.vlgmr.msra.gmra.mrb[0].mxu0 %v2240_v10 }
  0x70   : > { %1776 = vmatprep.mubr.f32.mxu0 %v2242_v11 }
  0x73   : > { %1777 = vmatmul.mubr.f32.gmra.mrb[2].mxu0 %v2248_v14 }
  0x74   : > { %1779 = vmatprep.mubr.f32.mxu0 %v2265_v22 }
  0x77   : > { %1780 = vmatmul.mubr.f32.gmra.mrb[4].mxu0 %v2273_v24 }
  0x78   : > { %1782 = vmatprep.mubr.f32.mxu0 %v2275_v25  ;;  %v2372_v25 = vsub.f32 %v970_v13, %v2367_v16 }
  0x7a   : > { %v1047_v36 = vand.u32 4294901760, %v2372_v25 }
  0x7b   : > { %1783 = vmatmul.mubr.f32.gmra.mrb[6].mxu0 %v2313_v50 }
  0x7c   : > { %v1048_v52 = vsub.f32 %v2372_v25, %v1047_v36 }
 0x142   : > { %v1775_v1 = vpop.f32.mrb[0].mxu0 }
 0x143   : > { %v953_v2 = vmul.f32 1.442695, %v1775_v1  ;;  %v905_v3 = vpop.f32.mrb[1].mxu0 }
 0x144   : > { %v951_v4 = vmul.f32 1.442695, %v905_v3 }
 0x145   : > { %2063 = vpow2.f32 %v953_v2 }
 0x146   : > { %2065 = vpow2.f32 %v951_v4  ;;  %v1778_v5 = vpop.f32.mrb[2].mxu0 }
 0x147   : > { %v957_v6 = vmul.f32 1.442695, %v1778_v5  ;;  %v917_v7 = vpop.f32.mrb[3].mxu0 }
 0x148   : > { %v955_v8 = vmul.f32 1.442695, %v917_v7 }
 0x149   : > { %2067 = vpow2.f32 %v957_v6 }
 0x14a   : > { %2069 = vpow2.f32 %v955_v8  ;;  %v1781_v10 = vpop.f32.mrb[4].mxu0 }
 0x14b   : > { %v961_v11 = vmul.f32 1.442695, %v1781_v10  ;;  %v929_v12 = vpop.f32.mrb[5].mxu0 }
 0x14c   : > { %v959_v14 = vmul.f32 1.442695, %v929_v12  ;;  %v1049_v12 = vand.u32 4294901760, %v1048_v52 }
 0x14d   : > { %2071 = vpow2.f32 %v961_v11 }
 0x14e   : > { %2073 = vpow2.f32 %v959_v14  ;;  %v1784_v15 = vpop.f32.mrb[6].mxu0 }
 0x14f   : > { %v2064_v17 = vpop.eup %2063  ;;  %v965_v18 = vmul.f32 1.442695, %v1784_v15  ;;  %v941_v19 = vpop.f32.mrb[7].mxu0 }
 0x150   : > { %v2066_v20 = vpop.eup %2065  ;;  %v963_v21 = vmul.f32 1.442695, %v941_v19  ;;  %v976_v22 = vand.u32 4294901760, %v2064_v17 }
 0x151   : > { %2075 = vpow2.f32 %v965_v18  ;;  %v973_v23 = vand.u32 4294901760, %v2066_v20 }
 0x152   : > { %2077 = vpow2.f32 %v963_v21  ;;  %v2369_v24 = vsub.f32 %v2064_v17, %v976_v22 }
 0x153   : > { %v2068_v26 = vpop.eup %2067  ;;  %v2374_v27 = vpack.c.bf16 %v976_v22, %v973_v23  ;;  %v2376_v28 = vsub.f32 %v2066_v20, %v973_v23 }
 0x154   : > { %v2070_v29 = vpop.eup %2069  ;;  %v982_v30 = vand.u32 4294901760, %v2068_v26  ;;  %v1065_v31 = vand.u32 4294901760, %v2369_v24 }
 0x155   : > { %1901 = vmatpush3.bf16.msra.mxu1 %v2374_v27  ;;  %v979_v32 = vand.u32 4294901760, %v2070_v29  ;;  %v1058_v33 = vand.u32 4294901760, %v2376_v28  ;;  %v1924_v34 = vpack.c.bf16 %v2369_v24, %v2376_v28 }
 0x156   : > { %1902 = vmatprep.subr.bf16.mxu1 %v2143_v63  ;;  %v2384_v35 = vsub.f32 %v2068_v26, %v982_v30  ;;  %v1066_v37 = vsub.f32 %v2369_v24, %v1065_v31 }
 0x157   : > { %v2072_v38 = vpop.eup %2071  ;;  %v2388_v39 = vpack.c.bf16 %v982_v30, %v979_v32  ;;  %v2390_v40 = vsub.f32 %v2070_v29, %v979_v32  ;;  %v1059_v41 = vsub.f32 %v2376_v28, %v1058_v33  ;;  %v2393_v42 = vpack.c.bf16 %v1065_v31, %v1058_v33 }
 0x158   : > { %v2074_v43 = vpop.eup %2073  ;;  %v988_v44 = vand.u32 4294901760, %v2072_v38  ;;  %v1067_v45 = vand.u32 4294901760, %v1066_v37  ;;  %v1079_v46 = vand.u32 4294901760, %v2384_v35 }
 0x159   : > { %1904 = vmatpush3.bf16.msra.mxu1 %v2388_v39  ;;  %v985_v47 = vand.u32 4294901760, %v2074_v43  ;;  %v1060_v48 = vand.u32 4294901760, %v1059_v41  ;;  %v1072_v49 = vand.u32 4294901760, %v2390_v40  ;;  %v1927_v50 = vpack.c.bf16 %v2384_v35, %v2390_v40 }
 0x15a   : > { %1905 = vmatprep.subr.bf16.mxu1 %v2143_v63  ;;  %v1092_v51 = vsub.f32 %v2072_v38, %v988_v44  ;;  %v1080_v53 = vsub.f32 %v2384_v35, %v1079_v46 }
 0x15b   : > { %v2076_v54 = vpop.eup %2075  ;;  %v2405_v55 = vpack.c.bf16 %v988_v44, %v985_v47  ;;  %v1085_v56 = vsub.f32 %v2074_v43, %v985_v47  ;;  %v1912_v57 = vpack.c.bf16 %v1067_v45, %v1060_v48  ;;  %v1073_v58 = vsub.f32 %v2390_v40, %v1072_v49 }
 0x15c   : > { %v2078_v59 = vpop.eup %2077  ;;  %v994_v60 = vand.u32 4294901760, %v2076_v54  ;;  %v1081_v61 = vand.u32 4294901760, %v1080_v53  ;;  %v1093_v62 = vand.u32 4294901760, %v1092_v51  ;;  %v1951_v1 = vpack.c.bf16 %v1079_v46, %v1072_v49 }
 0x15d   : > { %1907 = vmatpush3.bf16.msra.mxu1 %v2405_v55  ;;  %v991_v2 = vand.u32 4294901760, %v2078_v59  ;;  %v1074_v3 = vand.u32 4294901760, %v1073_v58  ;;  %v1086_v4 = vand.u32 4294901760, %v1085_v56  ;;  %v1930_v5 = vpack.c.bf16 %v1092_v51, %v1085_v56 }
 0x15e   : > { %1908 = vmatprep.subr.bf16.mxu1 %v2143_v63  ;;  %v1106_v6 = vsub.f32 %v2076_v54, %v994_v60  ;;  %v1094_v7 = vsub.f32 %v1092_v51, %v1093_v62 }
 0x15f   : > { %v2410_v8 = vpack.c.bf16 %v994_v60, %v991_v2  ;;  %v1099_v9 = vsub.f32 %v2078_v59, %v991_v2  ;;  %v1915_v10 = vpack.c.bf16 %v1081_v61, %v1074_v3  ;;  %v1087_v11 = vsub.f32 %v1085_v56, %v1086_v4 }
 0x160   : > { %v1095_v13 = vand.u32 4294901760, %v1094_v7  ;;  %v1107_v14 = vand.u32 4294901760, %v1106_v6  ;;  %v1954_v15 = vpack.c.bf16 %v1093_v62, %v1086_v4 }
 0x161   : > { %1910 = vmatpush3.bf16.msra.mxu1 %v2410_v8  ;;  %v1088_v17 = vand.u32 4294901760, %v1087_v11  ;;  %v1100_v18 = vand.u32 4294901760, %v1099_v9  ;;  %v1933_v19 = vpack.c.bf16 %v1106_v6, %v1099_v9 }
 0x162   : > { %1911 = vmatprep.subr.bf16.mxu1 %v2143_v63  ;;  %v1108_v20 = vsub.f32 %v1106_v6, %v1107_v14 }
 0x163   : > { %v1918_v21 = vpack.c.bf16 %v1095_v13, %v1088_v17  ;;  %v1101_v22 = vsub.f32 %v1099_v9, %v1100_v18  ;;  %v1957_v23 = vpack.c.bf16 %v1107_v14, %v1100_v18 }
 0x164   : > { %1802 = vmatmul.mubr.f32.vlgmr.msra.gmra.mrb[0].mxu1 %v1049_v12  ;;  %v1109_v26 = vand.u32 4294901760, %v1108_v20 }
 0x165   : > { %1913 = vmatpush3.bf16.msra.mxu1 %v1912_v57  ;;  %v1102_v29 = vand.u32 4294901760, %v1101_v22  ;;  %1820 = vmatprep.mubr.msk.f32.mxu1 %vm2144_vm2, %v2145_v0 }
 0x166   : > { %1914 = vmatprep.subr.bf16.mxu1 %v2143_v63 }
 0x167   : > { %v1921_v30 = vpack.c.bf16 %v1109_v26, %v1102_v29 }
 0x169   : > { %1916 = vmatpush3.bf16.msra.mxu1 %v1915_v10 }
 0x16a   : > { %1917 = vmatprep.subr.bf16.mxu1 %v2143_v63 }
 0x16d   : > { %1919 = vmatpush3.bf16.msra.mxu1 %v1918_v21 }
 0x16e   : > { %1920 = vmatprep.subr.bf16.mxu1 %v2143_v63 }
 0x171   : > { %1922 = vmatpush3.bf16.msra.mxu1 %v1921_v30 }
 0x172   : > { %1923 = vmatprep.subr.bf16.mxu1 %v2143_v63 }
 0x174   : > { %1821 = vmatmul.mubr.f32.vlgmr.msra.gmra.mrb[0].mxu1 %v2367_v16 }
 0x175   : > { %1925 = vmatpush3.bf16.msra.mxu1 %v1924_v34  ;;  %1839 = vmatprep.mubr.msk.f32.mxu1 %vm2144_vm2, %v2145_v0 }
 0x176   : > { %1926 = vmatprep.subr.bf16.mxu1 %v2143_v63 }
 0x179   : > { %1928 = vmatpush3.bf16.msra.mxu1 %v1927_v50 }
 0x17a   : > { %1929 = vmatprep.subr.bf16.mxu1 %v2143_v63 }
 0x17d   : > { %1931 = vmatpush3.bf16.msra.mxu1 %v1930_v5 }
 0x17e   : > { %1932 = vmatprep.subr.bf16.mxu1 %v2143_v63 }
 0x181   : > { %1934 = vmatpush3.bf16.msra.mxu1 %v1933_v19 }
 0x182   : > { %1935 = vmatprep.subr.bf16.mxu1 %v2143_v63 }
 0x184   : > { %1840 = vmatmul.mubr.f32.vlgmr.msra.gmra.mrb[0].mxu1 %v2372_v25 }
 0x185   : > { %1937 = vmatpush3.bf16.msra.mxu1 %v2374_v27  ;;  %1858 = vmatprep.mubr.msk.f32.mxu1 %vm2144_vm2, %v2145_v0 }
 0x186   : > { %1938 = vmatprep.subr.bf16.mxu1 %v2143_v63 }
 0x189   : > { %1940 = vmatpush3.bf16.msra.mxu1 %v2388_v39 }
 0x18a   : > { %1941 = vmatprep.subr.bf16.mxu1 %v2143_v63 }
 0x18d   : > { %1943 = vmatpush3.bf16.msra.mxu1 %v2405_v55 }
 0x18e   : > { %1944 = vmatprep.subr.bf16.mxu1 %v2143_v63 }
 0x191   : > { %1946 = vmatpush3.bf16.msra.mxu1 %v2410_v8 }
 0x192   : > { %1947 = vmatprep.subr.bf16.mxu1 %v2143_v63 }
 0x194   : > { %1859 = vmatmul.mubr.f32.vlgmr.msra.gmra.mrb[0].mxu1 %v1047_v36 }
 0x195   : > { %1949 = vmatpush3.bf16.msra.mxu1 %v2393_v42  ;;  %1877 = vmatprep.mubr.msk.f32.mxu1 %vm2144_vm2, %v2145_v0 }
 0x196   : > { %1950 = vmatprep.subr.bf16.mxu1 %v2143_v63 }
 0x199   : > { %1952 = vmatpush3.bf16.msra.mxu1 %v1951_v1 }
 0x19a   : > { %1953 = vmatprep.subr.bf16.mxu1 %v2143_v63 }
 0x19d   : > { %1955 = vmatpush3.bf16.msra.mxu1 %v1954_v15 }
 0x19e   : > { %1956 = vmatprep.subr.bf16.mxu1 %v2143_v63 }
 0x1a1   : > { %1958 = vmatpush3.bf16.msra.mxu1 %v1957_v23 }
 0x1a2   : > { %1959 = vmatprep.subr.bf16.mxu1 %v2143_v63 }
 0x1a4   : > { %1878 = vmatmul.mubr.f32.vlgmr.msra.gmra.mrb[0].mxu1 %v2367_v16 }
 0x1a5   : > { %1961 = vmatpush3.bf16.msra.mxu1 %v2374_v27  ;;  %1896 = vmatprep.mubr.msk.f32.mxu1 %vm2144_vm2, %v2145_v0 }
 0x1a6   : > { %1962 = vmatprep.subr.bf16.mxu1 %v2143_v63 }
 0x1a9   : > { %1964 = vmatpush3.bf16.msra.mxu1 %v2388_v39 }
 0x1aa   : > { %1965 = vmatprep.subr.bf16.mxu1 %v2143_v63 }
 0x1ad   : > { %1967 = vmatpush3.bf16.msra.mxu1 %v2405_v55 }
 0x1ae   : > { %1968 = vmatprep.subr.bf16.mxu1 %v2143_v63 }
 0x1b1   : > { %1970 = vmatpush3.bf16.msra.mxu1 %v2410_v8 }
 0x1b4   : > { %1897 = vmatmul.mubr.f32.vlgmr.msra.gmra.mrb[0].mxu1 %v2367_v16 }
 0x287   : > { %v1505_v63 = vpop.f32.mrb[0].mxu1 }
 0x288   : > { %1509 = vst [vmem:[%s161_s4] sm:$0xff] %v1505_v63  ;;  %v1898_v0 = vpop.f32.mrb[1].mxu1 }
 0x289   : > { %2092 = shalt.err (!%p2089_p3)
}
 0x28a   : > { %s2093_s20 = scalar_lea.hbm %s2468_s9, 128  ;;  %s2097_s26 = scalar_lea.hbm %s2511_s3, 256 }
 0x28b   : > { %p2094_p4 = scmp.ne.s32.totalorder %s2468_s9, %s2093_s20  ;;  %p2098_p9 = scmp.lt.u32.totalorder %s2468_s9, %s2511_s3 }
 0x28c   : > { %p2099_p10 = scmp.lt.u32.totalorder %s2097_s26, %s2093_s20  ;;  %p2101_p12 = scmp.lt.u32.totalorder %s2093_s20, %s2468_s9 }
 0x28d   : > { %p2095_p7 = pnand %p2094_p4, %p2205_p5 }
 0x28e   : > { %p2100_p11 = por %p2099_p10, %p2098_p9 }
 0x28f   : > { %p2096_p8 = pneg %p2095_p7 }
 0x290   : > { %p2102_p13 = por %p2101_p12, %p2100_p11 }
 0x292   : > { %p2103_p0 = pnand %p2102_p13, %p2096_p8 }
 0x294   : > { %2106 = shalt.err (!%p2103_p0)
}
 0x295   : > { %2021 = dma.vmem_to_hbm [thread:$0]  (%p2205_p5), %s2463_s5, 128, %s2468_s9, %s1511_s10  }
 0x296 PF: > { %p2027_p1 = scmp.ge.s32.totalorder %s2141_s15, 2  ;;  %s1536_s29 = sand.u32 1, %s2129_s12  }
 0x297   : > { %s1537_s30 = scalar_lea.sflag [#allocation3], %s1536_s29 }
 0x298   : > { %p2024_p2 = pnand %p2027_p1, %p2209_p6 }
 0x29a   : > { %2124 = dma.done.wait (!%p2024_p2), %s1537_s30, 128  }
 0x29b   : > { %2126 = vsyncadd (!%p2024_p2), %s1537_s30, 4294967168  ;;  %p13_p3 = scmp.ge.s32.totalorder %s2192_s18, 4   ;;  %s2514_s12 = smov %s2133_s13 }
 0x29c   : > { %s2515_s13 = smov %s2137_s14  ;;  %s2516_s14 = smov %s2203_s21 }
 0x29d   : > { %s2517_s15 = smov %s2192_s18  ;;  %15 = sbr.rel (!%p13_p3) target bundleno = 3 (0x3), region = 67 }
 0x2a4   :  { %1542 = vsyncpa [#allocation3], 1 }
 0x2a5   :  { %1544 = vsyncpa [#allocation3 + $0x1], 1 }

</bundles_post_ra>
